<compile_context>
chip_gen: v7x
topology: tpu7x:2x2x1
jax: 0.10.0
libtpu: 0.0.40
codegen_flags: <defaults>
</compile_context>

<pallas_src>
import jax
import jax.numpy as jnp
from jax.experimental import pallas as pl
from jax.experimental.pallas import tpu as pltpu


def enc_dec_kernel(we_ref, be_ref, x_ref, perm_ref, wbig_ref, bd_ref,
                   lat_ref, out_ref):
    # we_ref:   (C,)          SMEM  1x1-conv weights (out_channels == 1)
    # be_ref:   (1,)          SMEM  conv bias
    # x_ref:    (bt, C*H*W)   VMEM  batch tile, channel-major, spatial flattened
    # perm_ref: (H*W, W*H)    VMEM  0/1 permutation matrix for (h,w)->(w,h)
    # wbig_ref: (H*W, W*D)    VMEM  block-expanded decoder weight
    # bd_ref:   (1, W*D)      VMEM  decoder bias tiled W times
    # lat_ref:  (bt, W*H)     VMEM  latent slab, rows in (w, h) order
    # out_ref:  (bt, W*D)     VMEM  decoder slab, rows in (w, d) order
    HW = perm_ref.shape[0]
    C = x_ref.shape[1] // HW

    x = x_ref[...]                                   # lane-dense (bt, C*HW)

    # Encoder 1x1 conv == weighted channel sum on the VPU.  Channel slices are
    # static and 256-lane aligned; scalar weights come from SMEM; C unrolled.
    lat = x[:, :HW] * we_ref[0]
    for c in range(1, C):
        lat = lat + x[:, c * HW:(c + 1) * HW] * we_ref[c]
    lat = lat + be_ref[0]                            # (bt, H*W), (h, w) order

    # transpose(2,3) + squeeze(1): done as an MXU matmul against a permutation
    # matrix -> no XLU transpose / vreg relayout, and the store is a full
    # 256-lane unmasked vst (lane-dense out_spec).
    lat_ref[...] = jnp.dot(lat, perm_ref[...],
                           preferred_element_type=jnp.float32)

    # Decoder Linear: one MXU matmul against the block-expanded weight whose
    # output columns are already (w, d)-ordered -> lane-dense 512-wide store,
    # no post-matmul relayout.
    out_ref[...] = (
        jnp.dot(lat, wbig_ref[...], preferred_element_type=jnp.float32)
        + bd_ref[...]
    )


def _pick_batch_tile(n, per_elem_bytes, vmem_budget_bytes=6 << 20, cap=1024):
    """Rows per grid step, sized from a VMEM budget (double-buffered x tile +
    both output slabs) instead of a divisor search, so prime/odd N never
    collapses to bt=1.  The 6 MiB budget (+ ~1.5 MiB of constant operands)
    stays well inside the default scoped VMEM on v5e (16 MiB) / v6e / v7x
    (32 MiB), with headroom for v7x's 64 MiB physical VMEM."""
    bt = int(min(cap, max(1, vmem_budget_bytes // (2 * per_elem_bytes))))
    if bt >= n:
        if n < 32:
            # Tiny N: one bigger DMA beats two tiny grid steps (v5e single TC).
            return n            # block dim == full array dim -> always legal
        bt = pl.cdiv(n, 2)      # >=2 balanced steps -> v7x megacore sharding
    steps = pl.cdiv(n, bt)
    bt = pl.cdiv(n, steps)      # balance steps, minimize padding
    return ((bt + 7) // 8) * 8  # sublane-legal block dim whenever grid > 1


def model_forward(x, w_enc, b_enc, w_dec, b_dec):
    """x: (N, C, H, W) f32; w_enc: (1, C); b_enc: (1,); w_dec: (D, H) (out, in);
    b_dec: (D,).  Returns (latent (N, W, H), out (N, W, D))."""
    N, C, H, W = x.shape
    D = w_dec.shape[0]
    HW = H * W

    x2 = x.reshape(N, C * HW).astype(jnp.float32)     # free row-major reshape
    we = w_enc.reshape(C).astype(jnp.float32)
    be = b_enc.reshape(1).astype(jnp.float32)

    eye_w = jnp.eye(W, dtype=jnp.float32)
    # perm[h*W + w, w*H + h] = 1 : the (h,w)->(w,h) transpose as a matmul.
    perm = jnp.einsum('wv,hk->hwvk', eye_w,
                      jnp.eye(H, dtype=jnp.float32)).reshape(HW, W * H)
    # wbig[h*W + w, w*D + d] = w_dec[d, h] : decoder applied per-w column so
    # matmul output rows land directly in lane-dense (w, d) order.  (Also
    # avoids a standalone wrapper-side w_dec.T.)
    wbig = jnp.einsum('dh,vw->hvwd', w_dec.astype(jnp.float32),
                      eye_w).reshape(HW, W * D)
    bd_t = jnp.tile(b_dec.reshape(1, D).astype(jnp.float32), (1, W))  # (1, W*D)

    per_elem_bytes = 4 * (C * HW + W * H + W * D)
    bt = _pick_batch_tile(N, per_elem_bytes)
    n_pad = pl.cdiv(N, bt) * bt
    if n_pad != N:
        x2 = jnp.pad(x2, ((0, n_pad - N), (0, 0)))    # padded rows discarded
    grid = (n_pad // bt,)

    flops = n_pad * (2 * C * HW + 2 * HW * W * H + 2 * HW * W * D)
    bytes_accessed = 4 * (n_pad * (C * HW + W * H + W * D)
                          + HW * (W * H + W * D) + W * D + C + 1)

    lat2d, out2d = pl.pallas_call(
        enc_dec_kernel,
        out_shape=(
            jax.ShapeDtypeStruct((n_pad, W * H), jnp.float32),
            jax.ShapeDtypeStruct((n_pad, W * D), jnp.float32),
        ),
        grid=grid,
        in_specs=[
            pl.BlockSpec(memory_space=pltpu.MemorySpace.SMEM),   # we (scalars)
            pl.BlockSpec(memory_space=pltpu.MemorySpace.SMEM),   # be (scalar)
            pl.BlockSpec((bt, C * HW), lambda b: (b, 0)),        # x batch tile
            pl.BlockSpec((HW, W * H), lambda b: (0, 0)),         # perm (const)
            pl.BlockSpec((HW, W * D), lambda b: (0, 0)),         # wbig (const)
            pl.BlockSpec((1, W * D), lambda b: (0, 0)),          # bias (const)
        ],
        out_specs=(
            pl.BlockSpec((bt, W * H), lambda b: (b, 0)),         # latent slab
            pl.BlockSpec((bt, W * D), lambda b: (b, 0)),         # output slab
        ),
        compiler_params=pltpu.CompilerParams(
            dimension_semantics=("parallel",)),
        cost_estimate=pl.CostEstimate(
            flops=flops, transcendentals=0, bytes_accessed=bytes_accessed),
    )(we, be, x2, perm, wbig, bd_t)

    # Strip batch padding; slab -> (N, W, ·) are free row-major reshapes.
    return lat2d[:N].reshape(N, W, H), out2d[:N].reshape(N, W, D)


if __name__ == "__main__":
    N, C, H, W, D = 2, 4, 16, 16, 32

    key = jax.random.PRNGKey(0)
    kx, kwe, kbe, kwd, kbd = jax.random.split(key, 5)

    x = jax.random.normal(kx, (N, C, H, W), dtype=jnp.float32)
    w_enc = jax.random.normal(kwe, (1, C), dtype=jnp.float32) * 0.1
    b_enc = jax.random.normal(kbe, (1,), dtype=jnp.float32) * 0.1
    w_dec = jax.random.normal(kwd, (D, H), dtype=jnp.float32) * 0.1   # (out, in)
    b_dec = jax.random.normal(kbd, (D,), dtype=jnp.float32) * 0.1

    latent, out = model_forward(x, w_enc, b_enc, w_dec, b_dec)
    jax.block_until_ready((latent, out))

    # Pure-JAX reference (1x1 conv -> transpose(2,3) -> squeeze(1) -> Linear).
    lat_ref = jnp.einsum('nchw,c->nhw', x, w_enc[0]) + b_enc[0]       # (N, H, W)
    lat_ref = jnp.transpose(lat_ref, (0, 2, 1))                        # (N, W, H)
    out_ref = jnp.einsum('nwh,dh->nwd', lat_ref, w_dec) + b_dec        # (N, W, D)

    assert latent.shape == (N, W, H) and out.shape == (N, W, D)
    assert jnp.allclose(latent, lat_ref, atol=1e-4, rtol=1e-4)
    assert jnp.allclose(out, out_ref, atol=1e-4, rtol=1e-4)

    print("KERNEL_OK")
</pallas_src>

<mosaic_0001>
module attributes {stable_mosaic.version = 11 : i64} {
  func.func @enc_dec_kernel(%arg0: i32, %arg1: memref<4xf32, #tpu.memory_space<smem>>, %arg2: memref<1xf32, #tpu.memory_space<smem>>, %arg3: memref<2x1024xf32, #tpu.memory_space<vmem>>, %arg4: memref<256x256xf32, #tpu.memory_space<vmem>>, %arg5: memref<256x512xf32, #tpu.memory_space<vmem>>, %arg6: memref<1x512xf32, #tpu.memory_space<vmem>>, %arg7: memref<2x256xf32, #tpu.memory_space<vmem>>, %arg8: memref<2x512xf32, #tpu.memory_space<vmem>>) attributes {dimension_semantics = [#tpu.dimension_semantics<parallel>], iteration_bounds = array<i64: 1>, scalar_prefetch = 0 : i64, scratch_operands = 0 : i64, tpu.core_type = #tpu.core_type<tc>, window_params = [{transform_indices = @transform_0, window_bounds = array<i64: 4>}, {transform_indices = @transform_1, window_bounds = array<i64: 1>}, {transform_indices = @transform_2, window_bounds = array<i64: 2, 1024>}, {pipeline_mode = #tpu.pipeline_mode<synchronous>, transform_indices = @transform_3, window_bounds = array<i64: 256, 256>}, {pipeline_mode = #tpu.pipeline_mode<synchronous>, transform_indices = @transform_4, window_bounds = array<i64: 256, 512>}, {pipeline_mode = #tpu.pipeline_mode<synchronous>, transform_indices = @transform_5, window_bounds = array<i64: 1, 512>}, {transform_indices = @transform_6, window_bounds = array<i64: 2, 256>}, {transform_indices = @transform_7, window_bounds = array<i64: 2, 512>}]} {
    %c0 = arith.constant 0 : index
    %c0_0 = arith.constant 0 : index
    %0 = vector.load %arg3[%c0, %c0_0] : memref<2x1024xf32, #tpu.memory_space<vmem>>, vector<2x1024xf32>
    %1 = vector.extract_strided_slice %0 {offsets = [0, 0], sizes = [2, 256], strides = [1, 1]} : vector<2x1024xf32> to vector<2x256xf32>
    %c0_1 = arith.constant 0 : index
    %2 = memref.load %arg1[%c0_1] : memref<4xf32, #tpu.memory_space<smem>>
    %3 = vector.broadcast %2 : f32 to vector<2x256xf32>
    %4 = arith.mulf %1, %3 : vector<2x256xf32>
    %5 = vector.extract_strided_slice %0 {offsets = [0, 256], sizes = [2, 256], strides = [1, 1]} : vector<2x1024xf32> to vector<2x256xf32>
    %c1 = arith.constant 1 : index
    %6 = memref.load %arg1[%c1] : memref<4xf32, #tpu.memory_space<smem>>
    %7 = vector.broadcast %6 : f32 to vector<2x256xf32>
    %8 = arith.mulf %5, %7 : vector<2x256xf32>
    %9 = arith.addf %4, %8 : vector<2x256xf32>
    %10 = vector.extract_strided_slice %0 {offsets = [0, 512], sizes = [2, 256], strides = [1, 1]} : vector<2x1024xf32> to vector<2x256xf32>
    %c2 = arith.constant 2 : index
    %11 = memref.load %arg1[%c2] : memref<4xf32, #tpu.memory_space<smem>>
    %12 = vector.broadcast %11 : f32 to vector<2x256xf32>
    %13 = arith.mulf %10, %12 : vector<2x256xf32>
    %14 = arith.addf %9, %13 : vector<2x256xf32>
    %15 = vector.extract_strided_slice %0 {offsets = [0, 768], sizes = [2, 256], strides = [1, 1]} : vector<2x1024xf32> to vector<2x256xf32>
    %c3 = arith.constant 3 : index
    %16 = memref.load %arg1[%c3] : memref<4xf32, #tpu.memory_space<smem>>
    %17 = vector.broadcast %16 : f32 to vector<2x256xf32>
    %18 = arith.mulf %15, %17 : vector<2x256xf32>
    %19 = arith.addf %14, %18 : vector<2x256xf32>
    %c0_2 = arith.constant 0 : index
    %20 = memref.load %arg2[%c0_2] : memref<1xf32, #tpu.memory_space<smem>>
    %21 = vector.broadcast %20 : f32 to vector<2x256xf32>
    %22 = arith.addf %19, %21 : vector<2x256xf32>
    %c0_3 = arith.constant 0 : index
    %c0_4 = arith.constant 0 : index
    %23 = vector.load %arg4[%c0_3, %c0_4] : memref<256x256xf32, #tpu.memory_space<vmem>>, vector<256x256xf32>
    %cst = arith.constant dense<0.000000e+00> : vector<2x256xf32>
    %24 = tpu.matmul %22, %23, %cst {dimension_numbers = #tpu.dot_dimension_numbers<[1], [0], [0], [1], [0, 0, 1, 1], [], []>} : vector<2x256xf32>, vector<256x256xf32>, vector<2x256xf32> -> vector<2x256xf32>
    %c0_5 = arith.constant 0 : index
    %c0_6 = arith.constant 0 : index
    %25 = vector.load %arg7[%c0_5, %c0_6] : memref<2x256xf32, #tpu.memory_space<vmem>>, vector<2x256xf32>
    tpu.vector_store %arg7[%c0_5, %c0_6], %24 {strides = array<i32>} : memref<2x256xf32, #tpu.memory_space<vmem>>, vector<2x256xf32>,
    %c0_7 = arith.constant 0 : index
    %c0_8 = arith.constant 0 : index
    %26 = vector.load %arg5[%c0_7, %c0_8] : memref<256x512xf32, #tpu.memory_space<vmem>>, vector<256x512xf32>
    %cst_9 = arith.constant dense<0.000000e+00> : vector<2x512xf32>
    %27 = tpu.matmul %22, %26, %cst_9 {dimension_numbers = #tpu.dot_dimension_numbers<[1], [0], [0], [1], [0, 0, 1, 1], [], []>} : vector<2x256xf32>, vector<256x512xf32>, vector<2x512xf32> -> vector<2x512xf32>
    %c0_10 = arith.constant 0 : index
    %c0_11 = arith.constant 0 : index
    %28 = vector.load %arg6[%c0_10, %c0_11] : memref<1x512xf32, #tpu.memory_space<vmem>>, vector<1x512xf32>
    %29 = vector.broadcast %28 : vector<1x512xf32> to vector<2x512xf32>
    %30 = arith.addf %27, %29 : vector<2x512xf32>
    %c0_12 = arith.constant 0 : index
    %c0_13 = arith.constant 0 : index
    %31 = vector.load %arg8[%c0_12, %c0_13] : memref<2x512xf32, #tpu.memory_space<vmem>>, vector<2x512xf32>
    tpu.vector_store %arg8[%c0_12, %c0_13], %30 {strides = array<i32>} : memref<2x512xf32, #tpu.memory_space<vmem>>, vector<2x512xf32>,
    return
  }
  func.func @transform_0(%arg0: i32) -> i32 {
    %c0_i32 = arith.constant 0 : i32
    %c0_i32_0 = arith.constant 0 : i32
    return %c0_i32 : i32
  }
  func.func @transform_1(%arg0: i32) -> i32 {
    %c0_i32 = arith.constant 0 : i32
    %c0_i32_0 = arith.constant 0 : i32
    return %c0_i32 : i32
  }
  func.func @transform_2(%arg0: i32) -> (i32, i32) {
    %c0_i32 = arith.constant 0 : i32
    %c0_i32_0 = arith.constant 0 : i32
    return %arg0, %c0_i32 : i32, i32
  }
  func.func @transform_3(%arg0: i32) -> (i32, i32) {
    %c0_i32 = arith.constant 0 : i32
    %c0_i32_0 = arith.constant 0 : i32
    %c0_i32_1 = arith.constant 0 : i32
    return %c0_i32, %c0_i32_0 : i32, i32
  }
  func.func @transform_4(%arg0: i32) -> (i32, i32) {
    %c0_i32 = arith.constant 0 : i32
    %c0_i32_0 = arith.constant 0 : i32
    %c0_i32_1 = arith.constant 0 : i32
    return %c0_i32, %c0_i32_0 : i32, i32
  }
  func.func @transform_5(%arg0: i32) -> (i32, i32) {
    %c0_i32 = arith.constant 0 : i32
    %c0_i32_0 = arith.constant 0 : i32
    %c0_i32_1 = arith.constant 0 : i32
    return %c0_i32, %c0_i32_0 : i32, i32
  }
  func.func @transform_6(%arg0: i32) -> (i32, i32) {
    %c0_i32 = arith.constant 0 : i32
    %c0_i32_0 = arith.constant 0 : i32
    return %arg0, %c0_i32 : i32, i32
  }
  func.func @transform_7(%arg0: i32) -> (i32, i32) {
    %c0_i32 = arith.constant 0 : i32
    %c0_i32_0 = arith.constant 0 : i32
    return %arg0, %c0_i32 : i32, i32
  }
}

</mosaic_0001>

<bundles_post_ra>
// kernel: tpu_custom_call.1
= control target key start
LH: loop header
LB: loop body
LE: loop exit
PB: predicated region body
PF: predicated region fallthrough
CT: control target
= control target key end

     0   :  { %14 = vsyncpa [#allocation6], 0  ;;  %s1112_s0 = inlined_call_operand.vmem [shape: f32[4], index: 0, kind: input, shape index: {}]   ;;  %s1113_s1 = inlined_call_operand.<no memory space> [shape: f32[1], index: 1, kind: input, shape index: {}]   ;;  %s1114_s2 = inlined_call_operand.hbm [shape: f32[2,1024], index: 2, kind: input, shape index: {}]   ;;  %s1115_s3 = inlined_call_operand.hbm [shape: f32[256,256], index: 3, kind: input, shape index: {}]   ;;  %s1116_s4 = inlined_call_operand.hbm [shape: f32[256,512], index: 4, kind: input, shape index: {}]   ;;  %s1117_s5 = inlined_call_operand.vmem [shape: f32[1,512], index: 5, kind: input, shape index: {}]   ;;  %s1118_s6 = inlined_call_operand.hbm [shape: f32[2,256], index: 6, kind: output, shape index: {0}]   ;;  %s1119_s7 = inlined_call_operand.hbm [shape: f32[2,512], index: 7, kind: output, shape index: {1}]  }
   0x1   :  { %15 = vsyncpa [#allocation4], 0 }
   0x2   :  { %16 = vsyncpa [#allocation9], 0 }
   0x3   :  { %17 = vsyncpa [#allocation5], 0 }
   0x4   :  { %18 = vsyncpa [#allocation13], 0  ;;  %s949_s24 = smov [#allocation8]   ;;  %s25_s28 = sshll.u32 %s1112_s0, 4  ;;  %s26_s28 = int_to_ptr.vmem [resolvable:$true] %s25_s28 }
   0x5   :  { %s46_s25 = sshll.u32 %s949_s24, 4  ;;  %s817_s8 = scalar_lea.hbm %s1115_s3, 8192  ;;  %s47_s25 = int_to_ptr.vmem [resolvable:$true] %s46_s25 }
   0x6   :  { %p818_p0 = scmp.ne.s32.totalorder %s1115_s3, %s817_s8  ;;  %p821_p1 = scmp.lt.u32.totalorder %s817_s8, %s1115_s3 }
   0x8   :  { %p823_p2 = pnand %p821_p1, %p818_p0 }
   0xa   :  { %826 = shalt.err (!%p823_p2)
}
   0xb   :  { %s827_s13 = scalar_lea.vmem %s47_s25, 8192  ;;  %p832_p4 = scmp.lt.s32.totalorder %s47_s25, %s47_s25 }
   0xc   :  { %p828_p3 = scmp.ne.s32.totalorder %s47_s25, %s827_s13  ;;  %p833_p5 = scmp.lt.s32.totalorder %s827_s13, %s827_s13 }
   0xe   :  { %p834_p6 = por %p833_p5, %p832_p4 }
  0x10   :  { %p835_p7 = pnand %p834_p6, %p828_p3 }
  0x12   :  { %838 = shalt.err (!%p835_p7)
}
  0x13   :  { %s950_s0 = smov 256   ;;  %s951_s14 = smov 16  }
  0x14   :  { %52 = dma.hbm_to_vmem [thread:$0]  %s1115_s3, 8192, %s47_s25, [#allocation9], %s950_s0, %s950_s0, %s951_s14  }
  0x15   :  { %s839_s17 = scalar_lea.vmem %s26_s28, 16  ;;  %p844_p9 = scmp.lt.s32.totalorder %s26_s28, %s26_s28 }
  0x16   :  { %p840_p8 = scmp.ne.s32.totalorder %s26_s28, %s839_s17  ;;  %p845_p10 = scmp.lt.s32.totalorder %s839_s17, %s839_s17 }
  0x18   :  { %p846_p11 = por %p845_p10, %p844_p9 }
  0x1a   :  { %p847_p12 = pnand %p846_p11, %p840_p8 }
  0x1c   :  { %850 = shalt.err (!%p847_p12)
}
  0x1d   :  { %s952_s18 = smov [#allocation3]   ;;  %s953_s19 = smov [#allocation7]  }
  0x1e   :  { %28 = dma.vmem_to_smem %s26_s28, 16, %s952_s18, [#allocation6]  }
  0x1f   :  { %s37_s20 = sshll.u32 %s953_s19, 4  ;;  %s954_s21 = smov [#allocation10]   ;;  %s38_s20 = int_to_ptr.vmem [resolvable:$true] %s37_s20 }
  0x20   :  { %s58_s22 = sshll.u32 %s954_s21, 4  ;;  %s851_s3 = scalar_lea.hbm %s1114_s2, 256  ;;  %s1015_s22 = int_to_ptr.vmem [resolvable:$true] %s58_s22 }
  0x21   :  { %p852_p13 = scmp.ne.s32.totalorder %s1114_s2, %s851_s3  ;;  %p855_p0 = scmp.lt.u32.totalorder %s851_s3, %s1114_s2 }
  0x23   :  { %p857_p1 = pnand %p855_p0, %p852_p13 }
  0x25   :  { %860 = shalt.err (!%p857_p1)
}
  0x26   :  { %s861_s28 = scalar_lea.vmem %s38_s20, 256  ;;  %p866_p3 = scmp.lt.s32.totalorder %s38_s20, %s38_s20 }
  0x27   :  { %p862_p2 = scmp.ne.s32.totalorder %s38_s20, %s861_s28  ;;  %p867_p4 = scmp.lt.s32.totalorder %s861_s28, %s861_s28 }
  0x29   :  { %p868_p5 = por %p867_p4, %p866_p3 }
  0x2b   :  { %p869_p6 = pnand %p868_p5, %p862_p2 }
  0x2d   :  { %872 = shalt.err (!%p869_p6)
}
  0x2e   :  { %40 = dma.hbm_to_vmem [thread:$0]  %s1114_s2, 256, %s38_s20, [#allocation4]  }
  0x2f   :  { %s873_s11 = scalar_lea.hbm %s1116_s4, 16384 }
  0x30   :  { %p874_p7 = scmp.ne.s32.totalorder %s1116_s4, %s873_s11  ;;  %p877_p8 = scmp.lt.u32.totalorder %s873_s11, %s1116_s4 }
  0x32   :  { %p879_p9 = pnand %p877_p8, %p874_p7 }
  0x34   :  { %882 = shalt.err (!%p879_p9)
}
  0x35   :  { %s883_s15 = scalar_lea.vmem %s1015_s22, 16384  ;;  %p888_p11 = scmp.lt.s32.totalorder %s1015_s22, %s1015_s22 }
  0x36   :  { %p884_p10 = scmp.ne.s32.totalorder %s1015_s22, %s883_s15  ;;  %p889_p12 = scmp.lt.s32.totalorder %s883_s15, %s883_s15 }
  0x38   :  { %p890_p13 = por %p889_p12, %p888_p11 }
  0x3a   :  { %p891_p0 = pnand %p890_p13, %p884_p10 }
  0x3c   :  { %894 = shalt.err (!%p891_p0)
}
  0x3d   :  { %s955_s2 = smov 512   ;;  %s956_s16 = smov 32  }
  0x3e   :  { %64 = dma.hbm_to_vmem [thread:$0]  %s1116_s4, 16384, %s1015_s22, [#allocation9], %s955_s2, %s955_s2, %s956_s16  }
  0x3f   :  { %939 = dma.done.wait [#allocation6], 16  }
  0x40   :  { %940 = vsyncadd [#allocation6], 4294967280 }
  0x41   :  { %941 = dma.done.wait [#allocation4], 256  }
  0x42   :  { %942 = vsyncadd [#allocation4], 4294967040 }
  0x43   :  { %943 = dma.done.wait [#allocation9], 24576  }
  0x44   :  { %944 = vsyncadd [#allocation9], 4294942720 }
  0x45   :  { %79 = sfence }
  0x46   :  { %v107_v0 = vld [vmem:[#allocation8 + $0x8] sm:$0xff]  ;;  %v109_v1 = vld [vmem:[#allocation8 + $0x18] sm:$0xff]  ;;  %v106_v2 = vld [vmem:[#allocation8] sm:$0xff]  ;;  %s1046_s4 = sld [smem:[#allocation3]]  ;;  %s1048_s19 = sld [smem:[#allocation3 + $0x1]]  ;;  %v174_v42 = vlaneseq }
  0x47   :  { %v614_v3 = vpack.c.bf16 %v109_v1, %v107_v0  ;;  %v108_v4 = vld [vmem:[#allocation8 + $0x10] sm:$0xff]  ;;  %v111_v5 = vld [vmem:[#allocation8 + $0x28] sm:$0xff]  ;;  %v113_v6 = vld [vmem:[#allocation8 + $0x38] sm:$0xff]  ;;  %s1050_s20 = sld [smem:[#allocation3 + $0x2]]  ;;  %s1052_s21 = sld [smem:[#allocation3 + $0x3]] }
  0x48   :  { %v616_v7 = vpack.c.bf16 %v108_v4, %v106_v2  ;;  %v618_v8 = vpack.c.bf16 %v113_v6, %v111_v5  ;;  %v110_v9 = vld [vmem:[#allocation8 + $0x20] sm:$0xff]  ;;  %v112_v10 = vld [vmem:[#allocation8 + $0x30] sm:$0xff]  ;;  %v115_v11 = vld [vmem:[#allocation8 + $0x48] sm:$0xff]  ;;  %v957_v49 = vmov 1983009808   ;;  %v1058_v5 = vshrl.u32 %v174_v42, 7 }
  0x49   :  { %615 = vmatprep.subr.bf16.mxu0 %v614_v3  ;;  %v117_v12 = vld [vmem:[#allocation8 + $0x58] sm:$0xff]  ;;  %v620_v13 = vpack.c.bf16 %v112_v10, %v110_v9  ;;  %v114_v15 = vld [vmem:[#allocation8 + $0x40] sm:$0xff]  ;;  %v116_v16 = vld [vmem:[#allocation8 + $0x50] sm:$0xff]  ;;  %v172_v50 = vunpack.c.l.s4 %v957_v49 }
  0x4a   :  { %617 = vmatpush1.bf16.msra.mxu0 %v616_v7  ;;  %v622_v14 = vpack.c.bf16 %v117_v12, %v115_v11  ;;  %v119_v17 = vld [vmem:[#allocation8 + $0x68] sm:$0xff]  ;;  %v121_v18 = vld [vmem:[#allocation8 + $0x78] sm:$0xff]  ;;  %v624_v19 = vpack.c.bf16 %v116_v16, %v114_v15  ;;  %v118_v21 = vld [vmem:[#allocation8 + $0x60] sm:$0xff] }
  0x4b   :  { %619 = vmatprep.subr.bf16.mxu0 %v618_v8  ;;  %v626_v20 = vpack.c.bf16 %v121_v18, %v119_v17  ;;  %v120_v22 = vld [vmem:[#allocation8 + $0x70] sm:$0xff]  ;;  %v123_v23 = vld [vmem:[#allocation8 + $0x88] sm:$0xff]  ;;  %v125_v24 = vld [vmem:[#allocation8 + $0x98] sm:$0xff]  ;;  %v173_v4 = vunpack.c.0.s8 %v172_v50 }
  0x4c   :  { %v628_v25 = vpack.c.bf16 %v120_v22, %v118_v21  ;;  %v630_v26 = vpack.c.bf16 %v125_v24, %v123_v23  ;;  %v122_v27 = vld [vmem:[#allocation8 + $0x80] sm:$0xff]  ;;  %v124_v28 = vld [vmem:[#allocation8 + $0x90] sm:$0xff]  ;;  %v127_v29 = vld [vmem:[#allocation8 + $0xa8] sm:$0xff]  ;;  %v83_v37 = vstv %s1046_s4  ;;  %v86_v47 = vstv %s1048_s19 }
  0x4d   :  { %v129_v30 = vld [vmem:[#allocation8 + $0xb8] sm:$0xff]  ;;  %v632_v31 = vpack.c.bf16 %v124_v28, %v122_v27  ;;  %v126_v33 = vld [vmem:[#allocation8 + $0xa0] sm:$0xff]  ;;  %v128_v34 = vld [vmem:[#allocation8 + $0xb0] sm:$0xff]  ;;  %v93_v48 = vstv %s1050_s20  ;;  %v97_v56 = vstv %s1052_s21 }
  0x4e   :  { %621 = vmatpush1.bf16.msra.mxu0 %v620_v13  ;;  %v634_v32 = vpack.c.bf16 %v129_v30, %v127_v29  ;;  %v131_v35 = vld [vmem:[#allocation8 + $0xc8] sm:$0xff]  ;;  %v133_v36 = vld [vmem:[#allocation8 + $0xd8] sm:$0xff]  ;;  %v636_v38 = vpack.c.bf16 %v128_v34, %v126_v33  ;;  %v130_v39 = vld [vmem:[#allocation8 + $0xc0] sm:$0xff]  ;;  %v1064_v29 = vsub.s32 %v173_v4, %v1058_v5 }
  0x4f   :  { %623 = vmatprep.subr.bf16.mxu0 %v622_v14  ;;  %v132_v40 = vld [vmem:[#allocation8 + $0xd0] sm:$0xff]  ;;  %v135_v41 = vld [vmem:[#allocation8 + $0xe8] sm:$0xff]  ;;  %v638_v43 = vpack.c.bf16 %v133_v36, %v131_v35  ;;  %v137_v44 = vld [vmem:[#allocation8 + $0xf8] sm:$0xff] }
  0x50   :  { %v80_v45 = vld [vmem:[#allocation7] sm:$0xff]  ;;  %v81_v46 = vld [vmem:[#allocation7 + $0x8] sm:$0xff]  ;;  %v265_v53 = vld [vmem:[#allocation10 + $0x8] sm:$0xff]  ;;  %v640_v60 = vpack.c.bf16 %v132_v40, %v130_v39  ;;  %v642_v3 = vpack.c.bf16 %v137_v44, %v135_v41 }
  0x51   :  { %v84_v51 = vmul.f32 %v83_v37, %v80_v45  ;;  %v88_v52 = vrot.slane %v80_v45, 4  ;;  %v269_v54 = vld [vmem:[#allocation10 + $0x28] sm:$0xff]  ;;  %v264_v55 = vld [vmem:[#allocation10] sm:$0xff]  ;;  %v99_v57 = vrot.slane %v81_v46, 4  ;;  %v136_v62 = vld [vmem:[#allocation8 + $0xf0] sm:$0xff]  ;;  %v94_v0 = vmul.f32 %v93_v48, %v81_v46 }
  0x52   :  { %625 = vmatpush1.bf16.msra.mxu0 %v624_v19  ;;  %v678_v58 = vpack.c.bf16 %v269_v54, %v265_v53  ;;  %v268_v59 = vld [vmem:[#allocation10 + $0x20] sm:$0xff]  ;;  %v273_v2 = vld [vmem:[#allocation10 + $0x48] sm:$0xff]  ;;  %v141_v10 = vld [vmem:[#allocation8 + $0x118] sm:$0xff] }
  0x53   :  { %627 = vmatprep.subr.bf16.mxu0 %v626_v20  ;;  %v134_v61 = vld [vmem:[#allocation8 + $0xe0] sm:$0xff]  ;;  %v90_v63 = vmul.f32 %v88_v52, %v86_v47  ;;  %v680_v1 = vpack.c.bf16 %v268_v59, %v264_v55  ;;  %v277_v6 = vld [vmem:[#allocation10 + $0x68] sm:$0xff]  ;;  %v101_v12 = vmul.f32 %v99_v57, %v97_v56  ;;  %v140_v24 = vld [vmem:[#allocation8 + $0x110] sm:$0xff] }
  0x54   :  { %679 = vmatprep.subr.bf16.mxu1 %v678_v58  ;;  %v272_v7 = vld [vmem:[#allocation10 + $0x40] sm:$0xff]  ;;  %v139_v9 = vld [vmem:[#allocation8 + $0x108] sm:$0xff]  ;;  %v682_v13 = vpack.c.bf16 %v277_v6, %v273_v2  ;;  %v644_v17 = vpack.c.bf16 %v136_v62, %v134_v61  ;;  %v145_v27 = vld [vmem:[#allocation8 + $0x138] sm:$0xff] }
  0x55   :  { %v276_v8 = vld [vmem:[#allocation10 + $0x60] sm:$0xff]  ;;  %v91_v11 = vadd.f32 %v90_v63, %v84_v51  ;;  %681 = vmatpush1.bf16.msra.mxu1 %v680_v1  ;;  %v281_v15 = vld [vmem:[#allocation10 + $0x88] sm:$0xff]  ;;  %v646_v22 = vpack.c.bf16 %v141_v10, %v139_v9  ;;  %v144_v41 = vld [vmem:[#allocation8 + $0x130] sm:$0xff] }
  0x56   :  { %629 = vmatpush1.bf16.msra.mxu0 %v628_v25  ;;  %v684_v14 = vpack.c.bf16 %v276_v8, %v272_v7  ;;  %v285_v16 = vld [vmem:[#allocation10 + $0xa8] sm:$0xff]  ;;  %683 = vmatprep.subr.bf16.mxu1 %v682_v13  ;;  %v280_v20 = vld [vmem:[#allocation10 + $0x80] sm:$0xff]  ;;  %v149_v44 = vld [vmem:[#allocation8 + $0x158] sm:$0xff] }
  0x57   :  { %631 = vmatprep.subr.bf16.mxu0 %v630_v26  ;;  %v95_v18 = vadd.f32 %v94_v0, %v91_v11  ;;  %v686_v19 = vpack.c.bf16 %v285_v16, %v281_v15  ;;  %v284_v21 = vld [vmem:[#allocation10 + $0xa0] sm:$0xff]  ;;  %v143_v25 = vld [vmem:[#allocation8 + $0x128] sm:$0xff]  ;;  %v104_v26 = vstv %s1113_s1  ;;  %v148_v56 = vld [vmem:[#allocation8 + $0x150] sm:$0xff]  ;;  %s958_s1 = smov [#allocation11]  }
  0x58   :  { %v138_v23 = vld [vmem:[#allocation8 + $0x100] sm:$0xff]  ;;  %v688_v30 = vpack.c.bf16 %v284_v21, %v280_v20  ;;  %v650_v39 = vpack.c.bf16 %v145_v27, %v143_v25  ;;  %v301_v42 = vld [vmem:[#allocation10 + $0x128] sm:$0xff]  ;;  %v153_v58 = vld [vmem:[#allocation8 + $0x178] sm:$0xff]  ;;  %s585_s24 = sshll.u32 %s958_s1, 4  ;;  %s586_s24 = int_to_ptr.vmem [resolvable:$true] %s585_s24 }
  0x59   :  { %v102_v28 = vadd.f32 %v101_v12, %v95_v18  ;;  %685 = vmatpush1.bf16.msra.mxu1 %v684_v14  ;;  %v288_v34 = vld [vmem:[#allocation10 + $0xc0] sm:$0xff]  ;;  %v648_v36 = vpack.c.bf16 %v140_v24, %v138_v23  ;;  %v305_v52 = vld [vmem:[#allocation10 + $0x148] sm:$0xff]  ;;  %v152_v4 = vld [vmem:[#allocation8 + $0x170] sm:$0xff]  ;;  %s895_s3 = scalar_lea.vmem %s586_s24, 64  ;;  %p900_p2 = scmp.lt.s32.totalorder %s586_s24, %s586_s24 }
  0x5a   :  { %633 = vmatpush1.bf16.msra.mxu0 %v632_v31  ;;  %v289_v31 = vld [vmem:[#allocation10 + $0xc8] sm:$0xff]  ;;  %687 = vmatprep.subr.bf16.mxu1 %v686_v19  ;;  %v292_v35 = vld [vmem:[#allocation10 + $0xe0] sm:$0xff]  ;;  %v157_v7 = vld [vmem:[#allocation8 + $0x198] sm:$0xff]  ;;  %p896_p1 = scmp.ne.s32.totalorder %s586_s24, %s895_s3  ;;  %p901_p3 = scmp.lt.s32.totalorder %s895_s3, %s895_s3 }
  0x5b   :  { %635 = vmatprep.subr.bf16.mxu0 %v634_v32  ;;  %v293_v32 = vld [vmem:[#allocation10 + $0xe8] sm:$0xff]  ;;  %v105_v37 = vadd.f32 %v104_v26, %v102_v28  ;;  %v142_v40 = vld [vmem:[#allocation8 + $0x120] sm:$0xff]  ;;  %v692_v46 = vpack.c.bf16 %v292_v35, %v288_v34  ;;  %v161_v19 = vld [vmem:[#allocation8 + $0x1b8] sm:$0xff] }
  0x5c   :  { %v690_v33 = vpack.c.bf16 %v293_v32, %v289_v31  ;;  %v296_v48 = vld [vmem:[#allocation10 + $0x100] sm:$0xff]  ;;  %v652_v50 = vpack.c.bf16 %v144_v41, %v142_v40  ;;  %v309_v53 = vld [vmem:[#allocation10 + $0x168] sm:$0xff]  ;;  %v165_v32 = vld [vmem:[#allocation8 + $0x1d8] sm:$0xff]  ;;  %p902_p4 = por %p901_p3, %p900_p2 }
  0x5d   :  { %v1067_v45 = vrot.slane %v105_v37, %v1064_v29  ;;  %689 = vmatpush1.bf16.msra.mxu1 %v688_v30  ;;  %v300_v49 = vld [vmem:[#allocation10 + $0x120] sm:$0xff]  ;;  %v151_v57 = vld [vmem:[#allocation8 + $0x168] sm:$0xff]  ;;  %v160_v30 = vld [vmem:[#allocation8 + $0x1b0] sm:$0xff] }
  0x5e   :  { %637 = vmatpush1.bf16.msra.mxu0 %v636_v38  ;;  %v297_v38 = vld [vmem:[#allocation10 + $0x108] sm:$0xff]  ;;  %691 = vmatprep.subr.bf16.mxu1 %v690_v33  ;;  %v146_v55 = vld [vmem:[#allocation8 + $0x140] sm:$0xff]  ;;  %v696_v59 = vpack.c.bf16 %v300_v49, %v296_v48  ;;  %v658_v2 = vpack.c.bf16 %v153_v58, %v151_v57  ;;  %v267_v57 = vld [vmem:[#allocation10 + $0x18] sm:$0xff]  ;;  %p903_p5 = pnand %p902_p4, %p896_p1 }
  0x5f   :  { %639 = vmatprep.subr.bf16.mxu0 %v638_v43  ;;  %v147_v43 = vld [vmem:[#allocation8 + $0x148] sm:$0xff]  ;;  %v694_v47 = vpack.c.bf16 %v301_v42, %v297_v38  ;;  %v1071_v51 = vcombine.high %v1067_v45, %v1067_v45  ;;  %v304_v61 = vld [vmem:[#allocation10 + $0x140] sm:$0xff]  ;;  %v656_v63 = vpack.c.bf16 %v148_v56, %v146_v55  ;;  %v164_v42 = vld [vmem:[#allocation8 + $0x1d0] sm:$0xff] }
  0x60   :  { %v654_v54 = vpack.c.bf16 %v149_v44, %v147_v43  ;;  %v308_v62 = vld [vmem:[#allocation10 + $0x160] sm:$0xff]  ;;  %v313_v0 = vld [vmem:[#allocation10 + $0x188] sm:$0xff]  ;;  %v169_v44 = vld [vmem:[#allocation8 + $0x1f8] sm:$0xff] }
  0x61   :  { %245 = vmatprep.mubr.f32.mxu0 %v1071_v51  ;;  %693 = vmatpush1.bf16.msra.mxu1 %v692_v46  ;;  %v317_v1 = vld [vmem:[#allocation10 + $0x1a8] sm:$0xff]  ;;  %v700_v8 = vpack.c.bf16 %v308_v62, %v304_v61  ;;  %v312_v10 = vld [vmem:[#allocation10 + $0x180] sm:$0xff]  ;;  %v168_v56 = vld [vmem:[#allocation8 + $0x1f0] sm:$0xff] }
  0x62   :  { %641 = vmatpush1.bf16.msra.mxu0 %v640_v60  ;;  %695 = vmatprep.subr.bf16.mxu1 %v694_v47  ;;  %v698_v60 = vpack.c.bf16 %v309_v53, %v305_v52  ;;  %v155_v6 = vld [vmem:[#allocation8 + $0x188] sm:$0xff]  ;;  %v702_v9 = vpack.c.bf16 %v317_v1, %v313_v0  ;;  %v316_v11 = vld [vmem:[#allocation10 + $0x1a0] sm:$0xff]  ;;  %v271_v58 = vld [vmem:[#allocation10 + $0x38] sm:$0xff] }
  0x63   :  { %643 = vmatprep.subr.bf16.mxu0 %v642_v3  ;;  %478 = vmatprep.mubr.f32.mxu1 %v1071_v51  ;;  %v150_v3 = vld [vmem:[#allocation8 + $0x160] sm:$0xff]  ;;  %v321_v13 = vld [vmem:[#allocation10 + $0x1c8] sm:$0xff]  ;;  %v662_v15 = vpack.c.bf16 %v157_v7, %v155_v6  ;;  %v704_v20 = vpack.c.bf16 %v316_v11, %v312_v10  ;;  %v275_v6 = vld [vmem:[#allocation10 + $0x58] sm:$0xff] }
  0x64   :  { %v660_v12 = vpack.c.bf16 %v152_v4, %v150_v3  ;;  %v325_v14 = vld [vmem:[#allocation10 + $0x1e8] sm:$0xff]  ;;  %v154_v16 = vld [vmem:[#allocation8 + $0x180] sm:$0xff]  ;;  %v266_v3 = vld [vmem:[#allocation10 + $0x10] sm:$0xff] }
  0x65   :  { %697 = vmatpush1.bf16.msra.mxu1 %v696_v59  ;;  %v159_v18 = vld [vmem:[#allocation8 + $0x1a8] sm:$0xff]  ;;  %v706_v21 = vpack.c.bf16 %v325_v14, %v321_v13  ;;  %v324_v23 = vld [vmem:[#allocation10 + $0x1e0] sm:$0xff]  ;;  %v270_v4 = vld [vmem:[#allocation10 + $0x30] sm:$0xff] }
  0x66   :  { %645 = vmatpush1.bf16.msra.mxu0 %v644_v17  ;;  %699 = vmatprep.subr.bf16.mxu1 %v698_v60  ;;  %v156_v17 = vld [vmem:[#allocation8 + $0x190] sm:$0xff]  ;;  %v329_v25 = vld [vmem:[#allocation10 + $0x208] sm:$0xff]  ;;  %v666_v27 = vpack.c.bf16 %v161_v19, %v159_v18  ;;  %v158_v28 = vld [vmem:[#allocation8 + $0x1a0] sm:$0xff] }
  0x67   :  { %647 = vmatprep.subr.bf16.mxu0 %v646_v22  ;;  %v320_v22 = vld [vmem:[#allocation10 + $0x1c0] sm:$0xff]  ;;  %v664_v24 = vpack.c.bf16 %v156_v17, %v154_v16  ;;  %v333_v26 = vld [vmem:[#allocation10 + $0x228] sm:$0xff]  ;;  %v668_v37 = vpack.c.bf16 %v160_v30, %v158_v28  ;;  %v279_v7 = vld [vmem:[#allocation10 + $0x78] sm:$0xff] }
  0x68   :  { %v163_v31 = vld [vmem:[#allocation8 + $0x1c8] sm:$0xff]  ;;  %v708_v33 = vpack.c.bf16 %v324_v23, %v320_v22  ;;  %v710_v34 = vpack.c.bf16 %v333_v26, %v329_v25  ;;  %v328_v35 = vld [vmem:[#allocation10 + $0x200] sm:$0xff]  ;;  %v274_v16 = vld [vmem:[#allocation10 + $0x50] sm:$0xff] }
  0x69   :  { %701 = vmatpush1.bf16.msra.mxu1 %v700_v8  ;;  %v337_v38 = vld [vmem:[#allocation10 + $0x248] sm:$0xff]  ;;  %v670_v40 = vpack.c.bf16 %v165_v32, %v163_v31  ;;  %v162_v41 = vld [vmem:[#allocation8 + $0x1c0] sm:$0xff]  ;;  %v278_v17 = vld [vmem:[#allocation10 + $0x70] sm:$0xff] }
  0x6a   :  { %649 = vmatpush1.bf16.msra.mxu0 %v648_v36  ;;  %703 = vmatprep.subr.bf16.mxu1 %v702_v9  ;;  %v332_v36 = vld [vmem:[#allocation10 + $0x220] sm:$0xff]  ;;  %v167_v43 = vld [vmem:[#allocation8 + $0x1e8] sm:$0xff]  ;;  %v283_v18 = vld [vmem:[#allocation10 + $0x98] sm:$0xff] }
  0x6b   :  { %651 = vmatprep.subr.bf16.mxu0 %v650_v39  ;;  %v341_v39 = vld [vmem:[#allocation10 + $0x268] sm:$0xff]  ;;  %v712_v46 = vpack.c.bf16 %v332_v36, %v328_v35  ;;  %v336_v48 = vld [vmem:[#allocation10 + $0x240] sm:$0xff]  ;;  %v287_v19 = vld [vmem:[#allocation10 + $0xb8] sm:$0xff] }
  0x6c   :  { %v714_v47 = vpack.c.bf16 %v341_v39, %v337_v38  ;;  %v340_v49 = vld [vmem:[#allocation10 + $0x260] sm:$0xff]  ;;  %v345_v52 = vld [vmem:[#allocation10 + $0x288] sm:$0xff]  ;;  %v282_v28 = vld [vmem:[#allocation10 + $0x90] sm:$0xff] }
  0x6d   :  { %705 = vmatpush1.bf16.msra.mxu1 %v704_v20  ;;  %v349_v53 = vld [vmem:[#allocation10 + $0x2a8] sm:$0xff]  ;;  %v166_v55 = vld [vmem:[#allocation8 + $0x1e0] sm:$0xff]  ;;  %v716_v59 = vpack.c.bf16 %v340_v49, %v336_v48  ;;  %v286_v30 = vld [vmem:[#allocation10 + $0xb0] sm:$0xff] }
  0x6e   :  { %653 = vmatpush1.bf16.msra.mxu0 %v652_v50  ;;  %707 = vmatprep.subr.bf16.mxu1 %v706_v21  ;;  %v672_v50 = vpack.c.bf16 %v164_v42, %v162_v41  ;;  %v718_v60 = vpack.c.bf16 %v349_v53, %v345_v52  ;;  %v344_v61 = vld [vmem:[#allocation10 + $0x280] sm:$0xff]  ;;  %v353_v0 = vld [vmem:[#allocation10 + $0x2c8] sm:$0xff]  ;;  %v291_v31 = vld [vmem:[#allocation10 + $0xd8] sm:$0xff] }
  0x6f   :  { %655 = vmatprep.subr.bf16.mxu0 %v654_v54  ;;  %v674_v54 = vpack.c.bf16 %v169_v44, %v167_v43  ;;  %v348_v62 = vld [vmem:[#allocation10 + $0x2a0] sm:$0xff]  ;;  %v357_v1 = vld [vmem:[#allocation10 + $0x2e8] sm:$0xff]  ;;  %v295_v32 = vld [vmem:[#allocation10 + $0xf8] sm:$0xff] }
  0x70   :  { %v720_v8 = vpack.c.bf16 %v348_v62, %v344_v61  ;;  %v722_v9 = vpack.c.bf16 %v357_v1, %v353_v0  ;;  %v352_v10 = vld [vmem:[#allocation10 + $0x2c0] sm:$0xff]  ;;  %v361_v13 = vld [vmem:[#allocation10 + $0x308] sm:$0xff]  ;;  %v290_v41 = vld [vmem:[#allocation10 + $0xd0] sm:$0xff] }
  0x71   :  { %709 = vmatpush1.bf16.msra.mxu1 %v708_v33  ;;  %v356_v11 = vld [vmem:[#allocation10 + $0x2e0] sm:$0xff]  ;;  %v365_v14 = vld [vmem:[#allocation10 + $0x328] sm:$0xff]  ;;  %v299_v42 = vld [vmem:[#allocation10 + $0x118] sm:$0xff] }
  0x72   :  { %657 = vmatpush1.bf16.msra.mxu0 %v656_v63  ;;  %711 = vmatprep.subr.bf16.mxu1 %v710_v34  ;;  %v676_v63 = vpack.c.bf16 %v168_v56, %v166_v55  ;;  %v724_v20 = vpack.c.bf16 %v356_v11, %v352_v10  ;;  %v726_v21 = vpack.c.bf16 %v365_v14, %v361_v13  ;;  %v360_v22 = vld [vmem:[#allocation10 + $0x300] sm:$0xff]  ;;  %v369_v25 = vld [vmem:[#allocation10 + $0x348] sm:$0xff]  ;;  %v303_v43 = vld [vmem:[#allocation10 + $0x138] sm:$0xff] }
  0x73   :  { %659 = vmatprep.subr.bf16.mxu0 %v658_v2  ;;  %v742_v2 = vpack.c.bf16 %v271_v58, %v267_v57  ;;  %v364_v23 = vld [vmem:[#allocation10 + $0x320] sm:$0xff]  ;;  %v373_v26 = vld [vmem:[#allocation10 + $0x368] sm:$0xff]  ;;  %v758_v53 = vpack.c.bf16 %v303_v43, %v299_v42  ;;  %v302_v55 = vld [vmem:[#allocation10 + $0x130] sm:$0xff] }
  0x74   :  { %v728_v33 = vpack.c.bf16 %v364_v23, %v360_v22  ;;  %v730_v34 = vpack.c.bf16 %v373_v26, %v369_v25  ;;  %v368_v35 = vld [vmem:[#allocation10 + $0x340] sm:$0xff]  ;;  %v377_v38 = vld [vmem:[#allocation10 + $0x388] sm:$0xff]  ;;  %v307_v56 = vld [vmem:[#allocation10 + $0x158] sm:$0xff] }
  0x75   :  { %713 = vmatpush1.bf16.msra.mxu1 %v712_v46  ;;  %v372_v36 = vld [vmem:[#allocation10 + $0x360] sm:$0xff]  ;;  %v381_v39 = vld [vmem:[#allocation10 + $0x3a8] sm:$0xff]  ;;  %v311_v57 = vld [vmem:[#allocation10 + $0x178] sm:$0xff] }
  0x76   :  { %661 = vmatpush1.bf16.msra.mxu0 %v660_v12  ;;  %715 = vmatprep.subr.bf16.mxu1 %v714_v47  ;;  %v744_v12 = vpack.c.bf16 %v270_v4, %v266_v3  ;;  %v732_v44 = vpack.c.bf16 %v372_v36, %v368_v35  ;;  %v734_v46 = vpack.c.bf16 %v381_v39, %v377_v38  ;;  %v376_v47 = vld [vmem:[#allocation10 + $0x380] sm:$0xff]  ;;  %v389_v52 = vld [vmem:[#allocation10 + $0x3e8] sm:$0xff]  ;;  %v306_v0 = vld [vmem:[#allocation10 + $0x150] sm:$0xff] }
  0x77   :  { %663 = vmatprep.subr.bf16.mxu0 %v662_v15  ;;  %v746_v15 = vpack.c.bf16 %v279_v7, %v275_v6  ;;  %v380_v48 = vld [vmem:[#allocation10 + $0x3a0] sm:$0xff]  ;;  %v310_v1 = vld [vmem:[#allocation10 + $0x170] sm:$0xff]  ;;  %v319_v3 = vld [vmem:[#allocation10 + $0x1b8] sm:$0xff] }
  0x78   :  { %v736_v58 = vpack.c.bf16 %v380_v48, %v376_v47  ;;  %v388_v61 = vld [vmem:[#allocation10 + $0x3e0] sm:$0xff]  ;;  %v764_v6 = vpack.c.bf16 %v310_v1, %v306_v0  ;;  %v323_v10 = vld [vmem:[#allocation10 + $0x1d8] sm:$0xff]  ;;  %v322_v14 = vld [vmem:[#allocation10 + $0x1d0] sm:$0xff] }
  0x79   :  { %717 = vmatpush1.bf16.msra.mxu1 %v716_v59  ;;  %v327_v11 = vld [vmem:[#allocation10 + $0x1f8] sm:$0xff]  ;;  %v338_v26 = vld [vmem:[#allocation10 + $0x250] sm:$0xff] }
  0x7a   :  { %665 = vmatpush1.bf16.msra.mxu0 %v664_v24  ;;  %719 = vmatprep.subr.bf16.mxu1 %v718_v60  ;;  %v748_v24 = vpack.c.bf16 %v278_v17, %v274_v16  ;;  %v384_v60 = vld [vmem:[#allocation10 + $0x3c0] sm:$0xff]  ;;  %v770_v13 = vpack.c.bf16 %v327_v11, %v323_v10  ;;  %v331_v16 = vld [vmem:[#allocation10 + $0x218] sm:$0xff]  ;;  %v354_v39 = vld [vmem:[#allocation10 + $0x2d0] sm:$0xff] }
  0x7b   :  { %667 = vmatprep.subr.bf16.mxu0 %v666_v27  ;;  %v750_v27 = vpack.c.bf16 %v287_v19, %v283_v18  ;;  %v740_v4 = vpack.c.bf16 %v388_v61, %v384_v60  ;;  %v335_v17 = vld [vmem:[#allocation10 + $0x238] sm:$0xff]  ;;  %v386_v0 = vld [vmem:[#allocation10 + $0x3d0] sm:$0xff] }
  0x7c   :  { %v774_v19 = vpack.c.bf16 %v335_v17, %v331_v16  ;;  %v339_v22 = vld [vmem:[#allocation10 + $0x258] sm:$0xff]  ;;  %v390_v1 = vld [vmem:[#allocation10 + $0x3f0] sm:$0xff] }
  0x7d   :  { %721 = vmatpush1.bf16.msra.mxu1 %v720_v8  ;;  %v314_v8 = vld [vmem:[#allocation10 + $0x190] sm:$0xff]  ;;  %v343_v23 = vld [vmem:[#allocation10 + $0x278] sm:$0xff] }
  0x7e   :  { %669 = vmatpush1.bf16.msra.mxu0 %v668_v37  ;;  %723 = vmatprep.subr.bf16.mxu1 %v722_v9  ;;  %v752_v37 = vpack.c.bf16 %v286_v30, %v282_v28  ;;  %v318_v9 = vld [vmem:[#allocation10 + $0x1b0] sm:$0xff]  ;;  %v778_v25 = vpack.c.bf16 %v343_v23, %v339_v22  ;;  %v347_v28 = vld [vmem:[#allocation10 + $0x298] sm:$0xff] }
  0x7f   :  { %671 = vmatprep.subr.bf16.mxu0 %v670_v40  ;;  %v754_v40 = vpack.c.bf16 %v295_v32, %v291_v31  ;;  %v351_v30 = vld [vmem:[#allocation10 + $0x2b8] sm:$0xff] }
  0x80   :  { %v782_v32 = vpack.c.bf16 %v351_v30, %v347_v28  ;;  %v355_v35 = vld [vmem:[#allocation10 + $0x2d8] sm:$0xff] }
  0x81   :  { %725 = vmatpush1.bf16.msra.mxu1 %v724_v20  ;;  %v330_v20 = vld [vmem:[#allocation10 + $0x210] sm:$0xff]  ;;  %v359_v36 = vld [vmem:[#allocation10 + $0x2f8] sm:$0xff] }
  0x82   :  { %673 = vmatpush1.bf16.msra.mxu0 %v672_v50  ;;  %727 = vmatprep.subr.bf16.mxu1 %v726_v21  ;;  %v385_v50 = vld [vmem:[#allocation10 + $0x3c8] sm:$0xff]  ;;  %v334_v21 = vld [vmem:[#allocation10 + $0x230] sm:$0xff]  ;;  %v786_v38 = vpack.c.bf16 %v359_v36, %v355_v35  ;;  %v371_v47 = vld [vmem:[#allocation10 + $0x358] sm:$0xff] }
  0x83   :  { %675 = vmatprep.subr.bf16.mxu0 %v674_v54  ;;  %v298_v54 = vld [vmem:[#allocation10 + $0x110] sm:$0xff]  ;;  %v738_v59 = vpack.c.bf16 %v389_v52, %v385_v50  ;;  %v375_v48 = vld [vmem:[#allocation10 + $0x378] sm:$0xff] }
  0x84   :  { %v760_v62 = vpack.c.bf16 %v302_v55, %v298_v54  ;;  %v794_v50 = vpack.c.bf16 %v375_v48, %v371_v47  ;;  %v370_v52 = vld [vmem:[#allocation10 + $0x350] sm:$0xff]  ;;  %v379_v54 = vld [vmem:[#allocation10 + $0x398] sm:$0xff] }
  0x85   :  { %729 = vmatpush1.bf16.msra.mxu1 %v728_v33  ;;  %v346_v33 = vld [vmem:[#allocation10 + $0x290] sm:$0xff]  ;;  %v383_v55 = vld [vmem:[#allocation10 + $0x3b8] sm:$0xff] }
  0x86   :  { %677 = vmatpush1.bf16.msra.mxu0 %v676_v63  ;;  %731 = vmatprep.subr.bf16.mxu1 %v730_v34  ;;  %v762_v63 = vpack.c.bf16 %v311_v57, %v307_v56  ;;  %v350_v34 = vld [vmem:[#allocation10 + $0x2b0] sm:$0xff]  ;;  %v798_v57 = vpack.c.bf16 %v383_v55, %v379_v54  ;;  %v387_v60 = vld [vmem:[#allocation10 + $0x3d8] sm:$0xff] }
  0x87   :  { %743 = vmatprep.subr.bf16.mxu0 %v742_v2  ;;  %v315_v2 = vld [vmem:[#allocation10 + $0x198] sm:$0xff] }
  0x88   :  { %v766_v7 = vpack.c.bf16 %v319_v3, %v315_v2  ;;  %v391_v61 = vld [vmem:[#allocation10 + $0x3f8] sm:$0xff]  ;;  %v804_v2 = vpack.c.bf16 %v390_v1, %v386_v0 }
  0x89   :  { %246 = vmatmul.mubr.f32.vlgmr.msra.gmra.mrb[0].mxu0 %v1067_v45  ;;  %733 = vmatpush1.bf16.msra.mxu1 %v732_v44  ;;  %v362_v44 = vld [vmem:[#allocation10 + $0x310] sm:$0xff] }
  0x8a   :  { %745 = vmatpush1.bf16.msra.mxu0 %v744_v12  ;;  %549 = vmatprep.mubr.f32.mxu0 %v1071_v51  ;;  %v294_v51 = vld [vmem:[#allocation10 + $0xf0] sm:$0xff]  ;;  %v768_v12 = vpack.c.bf16 %v318_v9, %v314_v8 }
  0x8b   :  { %747 = vmatprep.subr.bf16.mxu0 %v746_v15  ;;  %v756_v49 = vpack.c.bf16 %v294_v51, %v290_v41  ;;  %735 = vmatprep.subr.bf16.mxu1 %v734_v46  ;;  %v326_v15 = vld [vmem:[#allocation10 + $0x1f0] sm:$0xff]  ;;  %v363_v41 = vld [vmem:[#allocation10 + $0x318] sm:$0xff] }
  0x8c   :  { %v772_v18 = vpack.c.bf16 %v326_v15, %v322_v14  ;;  %v367_v51 = vld [vmem:[#allocation10 + $0x338] sm:$0xff]  ;;  %v366_v46 = vld [vmem:[#allocation10 + $0x330] sm:$0xff] }
  0x8d   :  { %737 = vmatpush1.bf16.msra.mxu1 %v736_v58  ;;  %v790_v43 = vpack.c.bf16 %v367_v51, %v363_v41  ;;  %v378_v58 = vld [vmem:[#allocation10 + $0x390] sm:$0xff] }
  0x8e   :  { %749 = vmatpush1.bf16.msra.mxu0 %v748_v24  ;;  %739 = vmatprep.subr.bf16.mxu1 %v738_v59  ;;  %v776_v24 = vpack.c.bf16 %v334_v21, %v330_v20  ;;  %v382_v59 = vld [vmem:[#allocation10 + $0x3b0] sm:$0xff] }
  0x8f   :  { %751 = vmatprep.subr.bf16.mxu0 %v750_v27  ;;  %v342_v27 = vld [vmem:[#allocation10 + $0x270] sm:$0xff] }
  0x90   :  { %v780_v31 = vpack.c.bf16 %v342_v27, %v338_v26 }
  0x91   :  { %741 = vmatpush1.bf16.msra.mxu1 %v740_v4 }
  0x92   :  { %753 = vmatpush1.bf16.msra.mxu0 %v752_v37  ;;  %v784_v37 = vpack.c.bf16 %v350_v34, %v346_v33 }
  0x93   :  { %755 = vmatprep.subr.bf16.mxu0 %v754_v40  ;;  %v358_v40 = vld [vmem:[#allocation10 + $0x2f0] sm:$0xff] }
  0x94   :  { %479 = vmatmul.mubr.f32.vlgmr.msra.gmra.mrb[0].mxu1 %v1067_v45  ;;  %v788_v42 = vpack.c.bf16 %v358_v40, %v354_v39 }
  0x96   :  { %757 = vmatpush1.bf16.msra.mxu0 %v756_v49  ;;  %v792_v49 = vpack.c.bf16 %v366_v46, %v362_v44 }
  0x97   :  { %759 = vmatprep.subr.bf16.mxu0 %v758_v53  ;;  %v374_v53 = vld [vmem:[#allocation10 + $0x370] sm:$0xff] }
  0x98   :  { %v796_v56 = vpack.c.bf16 %v374_v53, %v370_v52 }
  0x9a   :  { %761 = vmatpush1.bf16.msra.mxu0 %v760_v62  ;;  %v800_v62 = vpack.c.bf16 %v382_v59, %v378_v58 }
  0x9b   :  { %763 = vmatprep.subr.bf16.mxu0 %v762_v63  ;;  %v802_v63 = vpack.c.bf16 %v391_v61, %v387_v60 }
  0x9e   :  { %765 = vmatpush1.bf16.msra.mxu0 %v764_v6 }
  0x9f   :  { %767 = vmatprep.subr.bf16.mxu0 %v766_v7 }
  0xa2   :  { %769 = vmatpush1.bf16.msra.mxu0 %v768_v12 }
  0xa3   :  { %771 = vmatprep.subr.bf16.mxu0 %v770_v13 }
  0xa6   :  { %773 = vmatpush1.bf16.msra.mxu0 %v772_v18 }
  0xa7   :  { %775 = vmatprep.subr.bf16.mxu0 %v774_v19 }
  0xaa   :  { %777 = vmatpush1.bf16.msra.mxu0 %v776_v24 }
  0xab   :  { %779 = vmatprep.subr.bf16.mxu0 %v778_v25 }
  0xae   :  { %781 = vmatpush1.bf16.msra.mxu0 %v780_v31 }
  0xaf   :  { %783 = vmatprep.subr.bf16.mxu0 %v782_v32 }
  0xb2   :  { %785 = vmatpush1.bf16.msra.mxu0 %v784_v37 }
  0xb3   :  { %787 = vmatprep.subr.bf16.mxu0 %v786_v38 }
  0xb6   :  { %789 = vmatpush1.bf16.msra.mxu0 %v788_v42 }
  0xb7   :  { %791 = vmatprep.subr.bf16.mxu0 %v790_v43 }
  0xba   :  { %793 = vmatpush1.bf16.msra.mxu0 %v792_v49 }
  0xbb   :  { %795 = vmatprep.subr.bf16.mxu0 %v794_v50 }
  0xbe   :  { %797 = vmatpush1.bf16.msra.mxu0 %v796_v56 }
  0xbf   :  { %799 = vmatprep.subr.bf16.mxu0 %v798_v57 }
  0xc2   :  { %801 = vmatpush1.bf16.msra.mxu0 %v800_v62 }
  0xc3   :  { %803 = vmatprep.subr.bf16.mxu0 %v802_v63 }
  0xc6   :  { %805 = vmatpush1.bf16.msra.mxu0 %v804_v2 }
  0xc9   :  { %550 = vmatmul.mubr.f32.vlgmr.msra.gmra.mrb[2].mxu0 %v1067_v45 }
 0x15c   :  { %v247_v3 = vpop.f32.mrb[0].mxu0 }
 0x15d   :  { %v249_v4 = vpop.f32.mrb[1].mxu0 }
 0x15e   :  { %v254_v6 = vcombine.low %v247_v3, %v249_v4 }
 0x160   :  { %613 = vst.sshfl [vmem:[#allocation11] sm:$0x33 pattern:$0x76325410] %v254_v6 }
 0x161   :  { %906 = shalt.err (!%p903_p5)
}
 0x162   :  { %s907_s27 = scalar_lea.hbm %s1118_s6, 64 }
 0x163   :  { %p908_p6 = scmp.ne.s32.totalorder %s1118_s6, %s907_s27  ;;  %p911_p7 = scmp.lt.u32.totalorder %s907_s27, %s1118_s6 }
 0x165   :  { %p913_p8 = pnand %p911_p7, %p908_p6 }
 0x167   :  { %916 = shalt.err (!%p913_p8)
}
 0x168   :  { %588 = dma.vmem_to_hbm [thread:$0]  %s586_s24, 64, %s1118_s6, [#allocation5]   ;;  %v396_v45 = vsub.s32 0, %v1058_v5  ;;  %v392_v7 = vld [vmem:[%s1117_s5] sm:$0xf]  ;;  %v400_v8 = vsub.s32 1, %v1058_v5 }
 0x169   :  { %v480_v11 = vpop.f32.mrb[0].mxu1  ;;  %v404_v16 = vsub.s32 2, %v1058_v5  ;;  %v408_v17 = vsub.s32 3, %v1058_v5  ;;  %s959_s5 = smov [#allocation12]  }
 0x16a   :  { %v397_v9 = vrot.slane %v392_v7, %v396_v45  ;;  %v401_v10 = vrot.slane %v392_v7, %v400_v8  ;;  %v482_v13 = vpop.f32.mrb[1].mxu1  ;;  %s595_s6 = sshll.u32 %s959_s5, 4  ;;  %s596_s6 = int_to_ptr.vmem [resolvable:$true] %s595_s6 }
 0x16b   :  { %v405_v18 = vrot.slane %v392_v7, %v404_v16  ;;  %v409_v19 = vrot.slane %v392_v7, %v408_v17  ;;  %s917_s13 = scalar_lea.vmem %s596_s6, 128  ;;  %p922_p10 = scmp.lt.s32.totalorder %s596_s6, %s596_s6 }
 0x16c   :  { %v481_v12 = vadd.f32 %v480_v11, %v397_v9  ;;  %v483_v14 = vadd.f32 %v482_v13, %v401_v10  ;;  %p918_p9 = scmp.ne.s32.totalorder %s596_s6, %s917_s13  ;;  %p923_p11 = scmp.lt.s32.totalorder %s917_s13, %s917_s13 }
 0x16e   :  { %v560_v15 = vcombine.low %v481_v12, %v483_v14  ;;  %p924_p12 = por %p923_p11, %p922_p10 }
 0x170   :  { %v568_v25 = vrot.slane %v560_v15, %v1064_v29  ;;  %p925_p13 = pnand %p924_p12, %p918_p9 }
 0x19c   :  { %v551_v20 = vpop.f32.mrb[2].mxu0 }
 0x19d   :  { %v552_v21 = vadd.f32 %v551_v20, %v405_v18  ;;  %v553_v22 = vpop.f32.mrb[3].mxu0 }
 0x19e   :  { %v554_v23 = vadd.f32 %v553_v22, %v409_v19 }
 0x1a0   :  { %v561_v24 = vcombine.low %v552_v21, %v554_v23 }
 0x1a2   :  { %v575_v26 = vrot.slane %v561_v24, %v1064_v29 }
 0x1a4   :  { %v576_v27 = vcombine.low %v568_v25, %v575_v26 }
 0x1a6   :  { %578 = vst [vmem:[#allocation12] sm:$0xff] %v576_v27 }
 0x1a7   :  { %928 = shalt.err (!%p925_p13)
}
 0x1a8   :  { %s929_s15 = scalar_lea.hbm %s1119_s7, 128 }
 0x1a9   :  { %p930_p0 = scmp.ne.s32.totalorder %s1119_s7, %s929_s15  ;;  %p933_p1 = scmp.lt.u32.totalorder %s929_s15, %s1119_s7 }
 0x1ab   :  { %p935_p2 = pnand %p933_p1, %p930_p0 }
 0x1ad   :  { %938 = shalt.err (!%p935_p2)
}
 0x1ae   :  { %598 = dma.vmem_to_hbm [thread:$0]  %s596_s6, 128, %s1119_s7, [#allocation13]  }
 0x1af   :  { %945 = dma.done.wait [#allocation5], 64  }
 0x1b0   :  { %946 = vsyncadd [#allocation5], 4294967232 }
 0x1b1   :  { %947 = dma.done.wait [#allocation13], 128  }
 0x1b2   :  { %948 = vsyncadd [#allocation13], 4294967168 }
 0x1b3   :  { %605 = vsyncpa [#allocation4], 1 }
 0x1b4   :  { %606 = vsyncpa [#allocation9], 1 }
 0x1b5   :  { %607 = vsyncpa [#allocation5], 1 }
 0x1b6   :  { %608 = vsyncpa [#allocation13], 1 }
 0x1b7   :  { %609 = vsyncpa [#allocation6], 1 }

</bundles_post_ra>
